<compile_context>
chip_gen: v7x
topology: tpu7x:2x2x1
jax: 0.10.0
libtpu: 0.0.40
codegen_flags: <defaults>
</compile_context>

<pallas_src>
import functools

import jax
import jax.numpy as jnp
from jax.experimental import pallas as pl
from jax.experimental.pallas import tpu as pltpu


def _round_up(n, m):
    return ((n + m - 1) // m) * m


# ----------------------------- kernel ---------------------------------------


def hafn_kernel(
    data_ref,   # (4, DMAX): rows = [x_last, x_flat, hist_flat, h_flat]
    w_ref,      # (ROWS, LMAX): all parameters packed into one slab
    out_ref,    # (1, output)
    h_out_ref,  # (1, R*Hr) lane-dense new hidden state
    *,
    f_pad, input_size, hist_size, rnn_width, hidden, output, hpad,
    off_rnn, off_x, off_hist, off_rnnkv, off_hid, off_bias,
):
    inv_scale = 1.0 / float(hidden)

    def ln(x, g, b):
        mu = jnp.mean(x, axis=-1, keepdims=True)
        var = jnp.mean((x - mu) ** 2, axis=-1, keepdims=True)
        return (x - mu) * jax.lax.rsqrt(var + 1e-5) * g + b

    def attend(q_row, k_row, v_row):
        # q/k/v are (1, H) rows representing (1, H, 1) columns in torch.
        # Build the transposed score matrix sT[j, i] = k[j] * q[i] / scale so
        # the softmax is a sublane reduce and the context comes out as a (1, H)
        # row with exactly one transpose per block.
        sT = jnp.transpose(k_row) * (q_row * inv_scale)              # (H, H)
        sT = sT - jnp.max(sT, axis=0, keepdims=True)
        e = jnp.exp(sT)
        inv_den = pl.reciprocal(jnp.sum(e, axis=0, keepdims=True), approx=True)
        aT = e * inv_den
        return jnp.dot(v_row, aT, preferred_element_type=jnp.float32)  # (1, H)

    def bias(i, n):
        return w_ref[off_bias + i:off_bias + i + 1, 0:n]

    def hid_w(i, n_out):
        r0 = off_hid + i * hpad
        return w_ref[r0:r0 + hidden, 0:n_out]

    # ----- packed data rows (all lane slices start at 0 -> no relayout) -----
    x_last = data_ref[0:1, 0:f_pad]
    x_flat = data_ref[1:2, 0:input_size]
    hist = data_ref[2:3, 0:hist_size]
    h_flat = data_ref[3:4, 0:rnn_width]

    # ----- packed biases / gains -----
    b_xq = bias(0, hidden + output)
    b_kv1 = bias(1, 2 * hidden)
    b_kv2 = bias(2, 2 * hidden)
    at1_b = bias(3, hidden)
    q2_b = bias(4, hidden)
    at2_b = bias(5, hidden)
    at3_b = bias(6, hidden)
    fu_b = bias(7, output)
    ln1_g = bias(8, hidden)
    ln1_b = bias(9, hidden)
    ln2_g = bias(10, hidden)
    ln2_b = bias(11, hidden)
    rnn_b = bias(12, rnn_width)

    # ----- RNN bank: two matmuls (stacked W_ih + block-diagonal W_hh) -----
    wih = w_ref[off_rnn:off_rnn + f_pad, 0:rnn_width]
    whh = w_ref[off_rnn + f_pad:off_rnn + f_pad + rnn_width, 0:rnn_width]
    h_new = jnp.tanh(
        jnp.dot(x_last, wih, preferred_element_type=jnp.float32)
        + jnp.dot(h_flat, whh, preferred_element_type=jnp.float32)
        + rnn_b
    )
    h_out_ref[...] = h_new                       # single lane-dense store
    rnn_flat = h_new                             # (1, R*Hr)

    # ----- fused projections sharing an input -----
    w_x = w_ref[off_x:off_x + input_size, 0:hidden + output]
    xq = jnp.dot(x_flat, w_x, preferred_element_type=jnp.float32) + b_xq
    q = xq[:, 0:hidden]
    ann_out = xq[:, hidden:hidden + output]

    w_hist = w_ref[off_hist:off_hist + hist_size, 0:2 * hidden]
    kv1 = jnp.dot(hist, w_hist, preferred_element_type=jnp.float32) + b_kv1
    k = kv1[:, 0:hidden]
    v = kv1[:, hidden:2 * hidden]

    # attention block 1 (torch forward re-uses layerNorm1 / layerNorm2)
    out = attend(q, k, v)
    out = ln(out + v, ln1_g, ln1_b)
    at1 = jnp.dot(out, hid_w(0, hidden), preferred_element_type=jnp.float32) + at1_b
    out = ln(at1 + out, ln2_g, ln2_b)

    # attention block 2: query from previous out, key/value from RNN bank
    w_rnnkv = w_ref[off_rnnkv:off_rnnkv + rnn_width, 0:2 * hidden]
    kv2 = jnp.dot(rnn_flat, w_rnnkv, preferred_element_type=jnp.float32) + b_kv2
    k = kv2[:, 0:hidden]
    v = kv2[:, hidden:2 * hidden]
    q = jnp.dot(out, hid_w(1, hidden), preferred_element_type=jnp.float32) + q2_b

    out = attend(q, k, v)
    out = ln(out + v, ln1_g, ln1_b)
    at2 = jnp.dot(out, hid_w(2, hidden), preferred_element_type=jnp.float32) + at2_b
    out = ln(at2 + out, ln2_g, ln2_b)

    at3 = jnp.maximum(
        jnp.dot(out, hid_w(3, hidden), preferred_element_type=jnp.float32) + at3_b,
        0.0,
    )
    fu = jnp.dot(at3, hid_w(4, output), preferred_element_type=jnp.float32) + fu_b
    out_ref[...] = ann_out + fu


# ----------------------------- param packing ---------------------------------


def prepare_params(p):
    """One-time packing of the 33 small tensors into ONE lane-padded slab."""
    rnn_wih = jnp.asarray(p["rnn_wih"], jnp.float32)   # (R, F, Hr)
    rnn_whh = jnp.asarray(p["rnn_whh"], jnp.float32)   # (R, Hr, Hr)
    rnn_b = jnp.asarray(p["rnn_b"], jnp.float32)       # (R, Hr)
    R, F, Hr = rnn_wih.shape
    rhr = R * Hr
    f_pad = _round_up(F, 8)
    hidden = int(p["ln1_g"].shape[-1])
    output = int(p["fc1_w"].shape[1])
    input_size = int(p["q1_w"].shape[0])
    hist_size = int(p["k1_w"].shape[0])
    hpad = _round_up(hidden, 8)
    whid = max(hidden, output)
    lmax = max(rhr, hidden + output, 2 * hidden, whid)

    def pad2d(a, rows, cols):
        a = jnp.asarray(a, jnp.float32)
        return jnp.pad(a, ((0, rows - a.shape[0]), (0, cols - a.shape[1])))

    # Section 0: RNN slab — stacked W_ih on top of a block-diagonal W_hh.
    wih_stacked = jnp.transpose(rnn_wih, (1, 0, 2)).reshape(F, rhr)
    wih_stacked = jnp.pad(wih_stacked, ((0, f_pad - F), (0, 0)))
    whh_bd = jnp.zeros((rhr, rhr), jnp.float32)
    for i in range(R):
        whh_bd = whh_bd.at[i * Hr:(i + 1) * Hr, i * Hr:(i + 1) * Hr].set(rnn_whh[i])
    sec_rnn = jnp.concatenate([wih_stacked, whh_bd], axis=0)   # (f_pad + rhr, rhr)

    # Fused projection sections (weights already stored as (in, out)).
    sec_x = jnp.concatenate([jnp.asarray(p["q1_w"], jnp.float32),
                             jnp.asarray(p["fc1_w"], jnp.float32)], axis=1)
    sec_hist = jnp.concatenate([jnp.asarray(p["k1_w"], jnp.float32),
                                jnp.asarray(p["v1_w"], jnp.float32)], axis=1)
    sec_rnnkv = jnp.concatenate([jnp.asarray(p["k2_w"], jnp.float32),
                                 jnp.asarray(p["v2_w"], jnp.float32)], axis=1)

    # Hidden-side weights stacked along sublanes, each padded to hpad rows so
    # every sub-block starts at a multiple-of-8 sublane offset.
    sec_hid = jnp.concatenate(
        [pad2d(p[name], hpad, whid)
         for name in ("at1_w", "q2_w", "at2_w", "at3_w", "fu_w")], axis=0)

    # Bias / LayerNorm rows.
    def brow(v):
        v = jnp.asarray(v, jnp.float32).reshape(1, -1)
        return jnp.pad(v, ((0, 0), (0, lmax - v.shape[1])))

    sec_bias = jnp.concatenate([
        brow(jnp.concatenate([jnp.asarray(p["q1_b"]), jnp.asarray(p["fc1_b"])], axis=1)),
        brow(jnp.concatenate([jnp.asarray(p["k1_b"]), jnp.asarray(p["v1_b"])], axis=1)),
        brow(jnp.concatenate([jnp.asarray(p["k2_b"]), jnp.asarray(p["v2_b"])], axis=1)),
        brow(p["at1_b"]), brow(p["q2_b"]), brow(p["at2_b"]), brow(p["at3_b"]),
        brow(p["fu_b"]),
        brow(p["ln1_g"]), brow(p["ln1_b"]), brow(p["ln2_g"]), brow(p["ln2_b"]),
        brow(rnn_b.reshape(1, rhr)),
    ], axis=0)                                                  # (13, lmax)

    # Stack all sections into one slab; 8-align every section offset.
    sections = [sec_rnn, sec_x, sec_hist, sec_rnnkv, sec_hid, sec_bias]
    offsets, padded, row = [], [], 0
    for s in sections:
        rpad = _round_up(s.shape[0], 8)
        offsets.append(row)
        padded.append(pad2d(s, rpad, lmax))
        row += rpad
    w_all = jnp.concatenate(padded, axis=0)                     # (ROWS, lmax)

    meta = dict(
        f_pad=f_pad, input_size=input_size, hist_size=hist_size,
        rnn_width=rhr, hidden=hidden, output=output, hpad=hpad,
        rnn_size=R, rnn_hidden=Hr,
        off_rnn=offsets[0], off_x=offsets[1], off_hist=offsets[2],
        off_rnnkv=offsets[3], off_hid=offsets[4], off_bias=offsets[5],
    )
    return w_all, meta


# ----------------------------- wrapper ---------------------------------------


def hafn_forward(x, history, h_in, w_all, *, meta):
    """x: (T, F), history: (history_size, F), h_in: (RNN_size, RNN_hidden)."""
    x = x.astype(jnp.float32)
    history = history.astype(jnp.float32)
    h_in = h_in.astype(jnp.float32)

    R, Hr = meta["rnn_size"], meta["rnn_hidden"]
    f_pad = meta["f_pad"]
    input_size = meta["input_size"]
    hist_size = meta["hist_size"]
    rnn_width = meta["rnn_width"]
    output = meta["output"]

    # Pack the per-call data into one (4, DMAX) slab (one DMA instead of four).
    dmax = max(f_pad, input_size, hist_size, rnn_width)

    def row(v):
        v = v.reshape(1, -1)
        return jnp.pad(v, ((0, 0), (0, dmax - v.shape[1])))

    data = jnp.concatenate(
        [row(x[-1, :]), row(x), row(history), row(h_in)], axis=0)

    kernel = functools.partial(
        hafn_kernel,
        f_pad=f_pad, input_size=input_size, hist_size=hist_size,
        rnn_width=rnn_width, hidden=meta["hidden"], output=output,
        hpad=meta["hpad"],
        off_rnn=meta["off_rnn"], off_x=meta["off_x"], off_hist=meta["off_hist"],
        off_rnnkv=meta["off_rnnkv"], off_hid=meta["off_hid"],
        off_bias=meta["off_bias"],
    )

    vmem = pl.BlockSpec(memory_space=pltpu.MemorySpace.VMEM)
    out, h_flat_new = pl.pallas_call(
        kernel,
        out_shape=(
            jax.ShapeDtypeStruct((1, output), jnp.float32),
            jax.ShapeDtypeStruct((1, rnn_width), jnp.float32),
        ),
        in_specs=[vmem, vmem],
        out_specs=(vmem, vmem),
    )(data, w_all)

    return out, h_flat_new.reshape(R, Hr)


# ----------------------------- pure-JAX reference -----------------------------


def hafn_reference(x, history, h_in, params):
    def lin(v, w, b):
        return v @ w + b

    def ln(v, g, b):
        mu = jnp.mean(v, axis=-1, keepdims=True)
        var = jnp.mean((v - mu) ** 2, axis=-1, keepdims=True)
        return (v - mu) / jnp.sqrt(var + 1e-5) * g + b

    def attend(q, k, v, scale):
        s = q.reshape(-1, 1) * k.reshape(1, -1) / scale
        a = jax.nn.softmax(s, axis=-1)
        return (a @ v.reshape(-1, 1)).reshape(1, -1)

    x_last = x[-1:, :]
    rnn_outs, h_new = [], []
    for i in range(h_in.shape[0]):
        h = jnp.tanh(x_last @ params["rnn_wih"][i]
                     + h_in[i:i + 1] @ params["rnn_whh"][i]
                     + params["rnn_b"][i:i + 1])
        h_new.append(h)
        rnn_outs.append(h)
    rnn_flat = jnp.concatenate(rnn_outs, axis=-1)
    h_new = jnp.concatenate(h_new, axis=0)

    x_flat = x.reshape(1, -1)
    hist = history.reshape(1, -1)
    H = params["ln1_g"].shape[-1]

    ann_out = lin(x_flat, params["fc1_w"], params["fc1_b"])

    v = lin(hist, params["v1_w"], params["v1_b"])
    out = attend(lin(x_flat, params["q1_w"], params["q1_b"]),
                 lin(hist, params["k1_w"], params["k1_b"]), v, float(H))
    out = ln(out + v, params["ln1_g"], params["ln1_b"])
    out = ln(lin(out, params["at1_w"], params["at1_b"]) + out,
             params["ln2_g"], params["ln2_b"])

    v = lin(rnn_flat, params["v2_w"], params["v2_b"])
    out = attend(lin(out, params["q2_w"], params["q2_b"]),
                 lin(rnn_flat, params["k2_w"], params["k2_b"]), v, float(H))
    out = ln(out + v, params["ln1_g"], params["ln1_b"])
    out = ln(lin(out, params["at2_w"], params["at2_b"]) + out,
             params["ln2_g"], params["ln2_b"])

    att = jnp.maximum(lin(out, params["at3_w"], params["at3_b"]), 0.0)
    return ann_out + lin(att, params["fu_w"], params["fu_b"]), h_new


# ----------------------------- param init ------------------------------------


def make_params(key, *, feature, T, history_size, rnn_size, rnn_hidden,
                hidden, output):
    input_size = T * feature
    hist_flat = history_size * feature
    rnn_flat = rnn_size * rnn_hidden

    def dense(k, n_in, n_out):
        kw, kb = jax.random.split(k)
        s = 1.0 / jnp.sqrt(n_in)
        w = jax.random.uniform(kw, (n_in, n_out), jnp.float32, -s, s)
        b = jax.random.uniform(kb, (1, n_out), jnp.float32, -s, s)
        return w, b

    keys = jax.random.split(key, 20)
    p = {}
    p["rnn_wih"] = 0.3 * jax.random.normal(keys[0], (rnn_size, feature, rnn_hidden), jnp.float32)
    p["rnn_whh"] = 0.3 * jax.random.normal(keys[1], (rnn_size, rnn_hidden, rnn_hidden), jnp.float32)
    p["rnn_b"] = 0.1 * jax.random.normal(keys[2], (rnn_size, rnn_hidden), jnp.float32)
    p["fc1_w"], p["fc1_b"] = dense(keys[3], input_size, output)
    p["q1_w"], p["q1_b"] = dense(keys[4], input_size, hidden)
    p["k1_w"], p["k1_b"] = dense(keys[5], hist_flat, hidden)
    p["v1_w"], p["v1_b"] = dense(keys[6], hist_flat, hidden)
    p["at1_w"], p["at1_b"] = dense(keys[7], hidden, hidden)
    p["q2_w"], p["q2_b"] = dense(keys[8], hidden, hidden)
    p["k2_w"], p["k2_b"] = dense(keys[9], rnn_flat, hidden)
    p["v2_w"], p["v2_b"] = dense(keys[10], rnn_flat, hidden)
    p["at2_w"], p["at2_b"] = dense(keys[11], hidden, hidden)
    p["at3_w"], p["at3_b"] = dense(keys[12], hidden, hidden)
    p["fu_w"], p["fu_b"] = dense(keys[13], hidden, output)
    p["ln1_g"] = jnp.ones((1, hidden), jnp.float32)
    p["ln1_b"] = jnp.zeros((1, hidden), jnp.float32)
    p["ln2_g"] = jnp.ones((1, hidden), jnp.float32)
    p["ln2_b"] = jnp.zeros((1, hidden), jnp.float32)
    return p


# ----------------------------- main ------------------------------------------


if __name__ == "__main__":
    FEATURE = 8
    T = 4
    HISTORY_SIZE = 8
    RNN_SIZE = 4
    RNN_HIDDEN = 16
    HIDDEN = 32
    OUTPUT = 8

    root = jax.random.PRNGKey(0)
    k_x, k_hist, k_h, k_p = jax.random.split(root, 4)

    x = jax.random.normal(k_x, (T, FEATURE), jnp.float32)
    history = jax.random.normal(k_hist, (HISTORY_SIZE, FEATURE), jnp.float32)
    h_in = jax.random.normal(k_h, (RNN_SIZE, RNN_HIDDEN), jnp.float32)
    params = make_params(k_p, feature=FEATURE, T=T, history_size=HISTORY_SIZE,
                         rnn_size=RNN_SIZE, rnn_hidden=RNN_HIDDEN,
                         hidden=HIDDEN, output=OUTPUT)

    w_all, meta = prepare_params(params)     # one-time packing outside the jit
    fwd = jax.jit(functools.partial(hafn_forward, meta=meta))

    out, h_new = fwd(x, history, h_in, w_all)
    out = jax.block_until_ready(out)
    h_new = jax.block_until_ready(h_new)

    out_ref, h_ref = hafn_reference(x, history, h_in, params)
    assert jnp.allclose(h_new, h_ref, atol=1e-4, rtol=1e-4), (h_new, h_ref)
    # Final output tolerance is slightly looser because the in-kernel softmax
    # uses the EUP approximate reciprocal.
    assert jnp.allclose(out, out_ref, atol=5e-3, rtol=5e-3), (out, out_ref)

    print("KERNEL_OK")
</pallas_src>

<mosaic_0001>
module attributes {stable_mosaic.version = 11 : i64} {
  func.func @hafn_kernel(%arg0: memref<4x64xf32, #tpu.memory_space<vmem>>, %arg1: memref<408x64xf32, #tpu.memory_space<vmem>>, %arg2: memref<1x8xf32, #tpu.memory_space<vmem>>, %arg3: memref<1x64xf32, #tpu.memory_space<vmem>>) attributes {dimension_semantics = [], scalar_prefetch = 0 : i64, scratch_operands = 0 : i64, tpu.core_type = #tpu.core_type<tc>} {
    %c0 = arith.constant 0 : index
    %c0_0 = arith.constant 0 : index
    %0 = vector.load %arg0[%c0, %c0_0] : memref<4x64xf32, #tpu.memory_space<vmem>>, vector<1x8xf32>
    %c1 = arith.constant 1 : index
    %c0_1 = arith.constant 0 : index
    %1 = vector.load %arg0[%c1, %c0_1] : memref<4x64xf32, #tpu.memory_space<vmem>>, vector<1x32xf32>
    %c2 = arith.constant 2 : index
    %c0_2 = arith.constant 0 : index
    %2 = vector.load %arg0[%c2, %c0_2] : memref<4x64xf32, #tpu.memory_space<vmem>>, vector<1x64xf32>
    %c3 = arith.constant 3 : index
    %c0_3 = arith.constant 0 : index
    %3 = vector.load %arg0[%c3, %c0_3] : memref<4x64xf32, #tpu.memory_space<vmem>>, vector<1x64xf32>
    %c392 = arith.constant 392 : index
    %c0_4 = arith.constant 0 : index
    %4 = vector.load %arg1[%c392, %c0_4] : memref<408x64xf32, #tpu.memory_space<vmem>>, vector<1x40xf32>
    %c393 = arith.constant 393 : index
    %c0_5 = arith.constant 0 : index
    %5 = vector.load %arg1[%c393, %c0_5] : memref<408x64xf32, #tpu.memory_space<vmem>>, vector<1x64xf32>
    %c394 = arith.constant 394 : index
    %c0_6 = arith.constant 0 : index
    %6 = vector.load %arg1[%c394, %c0_6] : memref<408x64xf32, #tpu.memory_space<vmem>>, vector<1x64xf32>
    %c395 = arith.constant 395 : index
    %c0_7 = arith.constant 0 : index
    %7 = vector.load %arg1[%c395, %c0_7] : memref<408x64xf32, #tpu.memory_space<vmem>>, vector<1x32xf32>
    %c396 = arith.constant 396 : index
    %c0_8 = arith.constant 0 : index
    %8 = vector.load %arg1[%c396, %c0_8] : memref<408x64xf32, #tpu.memory_space<vmem>>, vector<1x32xf32>
    %c397 = arith.constant 397 : index
    %c0_9 = arith.constant 0 : index
    %9 = vector.load %arg1[%c397, %c0_9] : memref<408x64xf32, #tpu.memory_space<vmem>>, vector<1x32xf32>
    %c398 = arith.constant 398 : index
    %c0_10 = arith.constant 0 : index
    %10 = vector.load %arg1[%c398, %c0_10] : memref<408x64xf32, #tpu.memory_space<vmem>>, vector<1x32xf32>
    %c399 = arith.constant 399 : index
    %c0_11 = arith.constant 0 : index
    %11 = vector.load %arg1[%c399, %c0_11] : memref<408x64xf32, #tpu.memory_space<vmem>>, vector<1x8xf32>
    %c400 = arith.constant 400 : index
    %c0_12 = arith.constant 0 : index
    %12 = vector.load %arg1[%c400, %c0_12] : memref<408x64xf32, #tpu.memory_space<vmem>>, vector<1x32xf32>
    %c401 = arith.constant 401 : index
    %c0_13 = arith.constant 0 : index
    %13 = vector.load %arg1[%c401, %c0_13] : memref<408x64xf32, #tpu.memory_space<vmem>>, vector<1x32xf32>
    %c402 = arith.constant 402 : index
    %c0_14 = arith.constant 0 : index
    %14 = vector.load %arg1[%c402, %c0_14] : memref<408x64xf32, #tpu.memory_space<vmem>>, vector<1x32xf32>
    %c403 = arith.constant 403 : index
    %c0_15 = arith.constant 0 : index
    %15 = vector.load %arg1[%c403, %c0_15] : memref<408x64xf32, #tpu.memory_space<vmem>>, vector<1x32xf32>
    %c404 = arith.constant 404 : index
    %c0_16 = arith.constant 0 : index
    %16 = vector.load %arg1[%c404, %c0_16] : memref<408x64xf32, #tpu.memory_space<vmem>>, vector<1x64xf32>
    %c0_17 = arith.constant 0 : index
    %c0_18 = arith.constant 0 : index
    %17 = vector.load %arg1[%c0_17, %c0_18] : memref<408x64xf32, #tpu.memory_space<vmem>>, vector<8x64xf32>
    %c8 = arith.constant 8 : index
    %c0_19 = arith.constant 0 : index
    %18 = vector.load %arg1[%c8, %c0_19] : memref<408x64xf32, #tpu.memory_space<vmem>>, vector<64x64xf32>
    %cst = arith.constant dense<0.000000e+00> : vector<1x64xf32>
    %19 = tpu.matmul %0, %17, %cst {dimension_numbers = #tpu.dot_dimension_numbers<[1], [0], [0], [1], [0, 0, 1, 1], [], []>} : vector<1x8xf32>, vector<8x64xf32>, vector<1x64xf32> -> vector<1x64xf32>
    %cst_20 = arith.constant dense<0.000000e+00> : vector<1x64xf32>
    %20 = tpu.matmul %3, %18, %cst_20 {dimension_numbers = #tpu.dot_dimension_numbers<[1], [0], [0], [1], [0, 0, 1, 1], [], []>} : vector<1x64xf32>, vector<64x64xf32>, vector<1x64xf32> -> vector<1x64xf32>
    %21 = arith.addf %19, %20 : vector<1x64xf32>
    %22 = arith.addf %21, %16 : vector<1x64xf32>
    %23 = math.tanh %22 : vector<1x64xf32>
    %c0_21 = arith.constant 0 : index
    %c0_22 = arith.constant 0 : index
    %24 = vector.load %arg3[%c0_21, %c0_22] : memref<1x64xf32, #tpu.memory_space<vmem>>, vector<1x64xf32>
    tpu.vector_store %arg3[%c0_21, %c0_22], %23 {strides = array<i32>} : memref<1x64xf32, #tpu.memory_space<vmem>>, vector<1x64xf32>,
    %c72 = arith.constant 72 : index
    %c0_23 = arith.constant 0 : index
    %25 = vector.load %arg1[%c72, %c0_23] : memref<408x64xf32, #tpu.memory_space<vmem>>, vector<32x40xf32>
    %cst_24 = arith.constant dense<0.000000e+00> : vector<1x40xf32>
    %26 = tpu.matmul %1, %25, %cst_24 {dimension_numbers = #tpu.dot_dimension_numbers<[1], [0], [0], [1], [0, 0, 1, 1], [], []>} : vector<1x32xf32>, vector<32x40xf32>, vector<1x40xf32> -> vector<1x40xf32>
    %27 = arith.addf %26, %4 : vector<1x40xf32>
    %28 = vector.extract_strided_slice %27 {offsets = [0, 0], sizes = [1, 32], strides = [1, 1]} : vector<1x40xf32> to vector<1x32xf32>
    %29 = vector.extract_strided_slice %27 {offsets = [0, 32], sizes = [1, 8], strides = [1, 1]} : vector<1x40xf32> to vector<1x8xf32>
    %c104 = arith.constant 104 : index
    %c0_25 = arith.constant 0 : index
    %30 = vector.load %arg1[%c104, %c0_25] : memref<408x64xf32, #tpu.memory_space<vmem>>, vector<64x64xf32>
    %cst_26 = arith.constant dense<0.000000e+00> : vector<1x64xf32>
    %31 = tpu.matmul %2, %30, %cst_26 {dimension_numbers = #tpu.dot_dimension_numbers<[1], [0], [0], [1], [0, 0, 1, 1], [], []>} : vector<1x64xf32>, vector<64x64xf32>, vector<1x64xf32> -> vector<1x64xf32>
    %32 = arith.addf %31, %5 : vector<1x64xf32>
    %33 = vector.extract_strided_slice %32 {offsets = [0, 0], sizes = [1, 32], strides = [1, 1]} : vector<1x64xf32> to vector<1x32xf32>
    %34 = vector.extract_strided_slice %32 {offsets = [0, 32], sizes = [1, 32], strides = [1, 1]} : vector<1x64xf32> to vector<1x32xf32>
    %35 = tpu.transpose %33, [1, 0] : vector<1x32xf32> -> vector<32x1xf32>
    %cst_27 = arith.constant 3.125000e-02 : f32
    %36 = vector.broadcast %cst_27 : f32 to vector<1x32xf32>
    %37 = arith.mulf %28, %36 : vector<1x32xf32>
    %38 = vector.broadcast %35 : vector<32x1xf32> to vector<32x32xf32>
    %39 = vector.broadcast %37 : vector<1x32xf32> to vector<32x32xf32>
    %40 = arith.mulf %38, %39 : vector<32x32xf32>
    %cst_28 = arith.constant dense<0xFF800000> : vector<32xf32>
    %41 = vector.multi_reduction <maximumf>, %40, %cst_28 [0] : vector<32x32xf32> to vector<32xf32>
    %42 = vector.shape_cast %41 : vector<32xf32> to vector<1x32xf32>
    %43 = vector.broadcast %42 : vector<1x32xf32> to vector<32x32xf32>
    %44 = arith.subf %40, %43 : vector<32x32xf32>
    %45 = math.exp %44 : vector<32x32xf32>
    %cst_29 = arith.constant dense<0.000000e+00> : vector<32xf32>
    %46 = vector.multi_reduction <add>, %45, %cst_29 [0] : vector<32x32xf32> to vector<32xf32>
    %47 = vector.shape_cast %46 : vector<32xf32> to vector<1x32xf32>
    %48 = tpu.reciprocal %47 {approx = true} : vector<1x32xf32> -> vector<1x32xf32>
    %49 = vector.broadcast %48 : vector<1x32xf32> to vector<32x32xf32>
    %50 = arith.mulf %45, %49 : vector<32x32xf32>
    %cst_30 = arith.constant dense<0.000000e+00> : vector<1x32xf32>
    %51 = tpu.matmul %34, %50, %cst_30 {dimension_numbers = #tpu.dot_dimension_numbers<[1], [0], [0], [1], [0, 0, 1, 1], [], []>} : vector<1x32xf32>, vector<32x32xf32>, vector<1x32xf32> -> vector<1x32xf32>
    %52 = arith.addf %51, %34 : vector<1x32xf32>
    %cst_31 = arith.constant dense<0.000000e+00> : vector<1xf32>
    %53 = vector.multi_reduction <add>, %52, %cst_31 [1] : vector<1x32xf32> to vector<1xf32>
    %54 = vector.shape_cast %53 : vector<1xf32> to vector<1x1xf32>
    %cst_32 = arith.constant 3.200000e+01 : f32
    %55 = vector.broadcast %cst_32 : f32 to vector<1x1xf32>
    %56 = arith.divf %54, %55 : vector<1x1xf32>
    %57 = vector.broadcast %56 : vector<1x1xf32> to vector<1x32xf32>
    %58 = arith.subf %52, %57 : vector<1x32xf32>
    %59 = arith.mulf %58, %58 : vector<1x32xf32>
    %cst_33 = arith.constant dense<0.000000e+00> : vector<1xf32>
    %60 = vector.multi_reduction <add>, %59, %cst_33 [1] : vector<1x32xf32> to vector<1xf32>
    %61 = vector.shape_cast %60 : vector<1xf32> to vector<1x1xf32>
    %cst_34 = arith.constant 3.200000e+01 : f32
    %62 = vector.broadcast %cst_34 : f32 to vector<1x1xf32>
    %63 = arith.divf %61, %62 : vector<1x1xf32>
    %64 = vector.broadcast %56 : vector<1x1xf32> to vector<1x32xf32>
    %65 = arith.subf %52, %64 : vector<1x32xf32>
    %cst_35 = arith.constant 9.99999974E-6 : f32
    %66 = vector.broadcast %cst_35 : f32 to vector<1x1xf32>
    %67 = arith.addf %63, %66 : vector<1x1xf32>
    %68 = math.rsqrt %67 : vector<1x1xf32>
    %69 = vector.broadcast %68 : vector<1x1xf32> to vector<1x32xf32>
    %70 = arith.mulf %65, %69 : vector<1x32xf32>
    %71 = arith.mulf %70, %12 : vector<1x32xf32>
    %72 = arith.addf %71, %13 : vector<1x32xf32>
    %c232 = arith.constant 232 : index
    %c0_36 = arith.constant 0 : index
    %73 = vector.load %arg1[%c232, %c0_36] : memref<408x64xf32, #tpu.memory_space<vmem>>, vector<32x32xf32>
    %cst_37 = arith.constant dense<0.000000e+00> : vector<1x32xf32>
    %74 = tpu.matmul %72, %73, %cst_37 {dimension_numbers = #tpu.dot_dimension_numbers<[1], [0], [0], [1], [0, 0, 1, 1], [], []>} : vector<1x32xf32>, vector<32x32xf32>, vector<1x32xf32> -> vector<1x32xf32>
    %75 = arith.addf %74, %7 : vector<1x32xf32>
    %76 = arith.addf %75, %72 : vector<1x32xf32>
    %cst_38 = arith.constant dense<0.000000e+00> : vector<1xf32>
    %77 = vector.multi_reduction <add>, %76, %cst_38 [1] : vector<1x32xf32> to vector<1xf32>
    %78 = vector.shape_cast %77 : vector<1xf32> to vector<1x1xf32>
    %cst_39 = arith.constant 3.200000e+01 : f32
    %79 = vector.broadcast %cst_39 : f32 to vector<1x1xf32>
    %80 = arith.divf %78, %79 : vector<1x1xf32>
    %81 = vector.broadcast %80 : vector<1x1xf32> to vector<1x32xf32>
    %82 = arith.subf %76, %81 : vector<1x32xf32>
    %83 = arith.mulf %82, %82 : vector<1x32xf32>
    %cst_40 = arith.constant dense<0.000000e+00> : vector<1xf32>
    %84 = vector.multi_reduction <add>, %83, %cst_40 [1] : vector<1x32xf32> to vector<1xf32>
    %85 = vector.shape_cast %84 : vector<1xf32> to vector<1x1xf32>
    %cst_41 = arith.constant 3.200000e+01 : f32
    %86 = vector.broadcast %cst_41 : f32 to vector<1x1xf32>
    %87 = arith.divf %85, %86 : vector<1x1xf32>
    %88 = vector.broadcast %80 : vector<1x1xf32> to vector<1x32xf32>
    %89 = arith.subf %76, %88 : vector<1x32xf32>
    %cst_42 = arith.constant 9.99999974E-6 : f32
    %90 = vector.broadcast %cst_42 : f32 to vector<1x1xf32>
    %91 = arith.addf %87, %90 : vector<1x1xf32>
    %92 = math.rsqrt %91 : vector<1x1xf32>
    %93 = vector.broadcast %92 : vector<1x1xf32> to vector<1x32xf32>
    %94 = arith.mulf %89, %93 : vector<1x32xf32>
    %95 = arith.mulf %94, %14 : vector<1x32xf32>
    %96 = arith.addf %95, %15 : vector<1x32xf32>
    %c168 = arith.constant 168 : index
    %c0_43 = arith.constant 0 : index
    %97 = vector.load %arg1[%c168, %c0_43] : memref<408x64xf32, #tpu.memory_space<vmem>>, vector<64x64xf32>
    %cst_44 = arith.constant dense<0.000000e+00> : vector<1x64xf32>
    %98 = tpu.matmul %23, %97, %cst_44 {dimension_numbers = #tpu.dot_dimension_numbers<[1], [0], [0], [1], [0, 0, 1, 1], [], []>} : vector<1x64xf32>, vector<64x64xf32>, vector<1x64xf32> -> vector<1x64xf32>
    %99 = arith.addf %98, %6 : vector<1x64xf32>
    %100 = vector.extract_strided_slice %99 {offsets = [0, 0], sizes = [1, 32], strides = [1, 1]} : vector<1x64xf32> to vector<1x32xf32>
    %101 = vector.extract_strided_slice %99 {offsets = [0, 32], sizes = [1, 32], strides = [1, 1]} : vector<1x64xf32> to vector<1x32xf32>
    %c264 = arith.constant 264 : index
    %c0_45 = arith.constant 0 : index
    %102 = vector.load %arg1[%c264, %c0_45] : memref<408x64xf32, #tpu.memory_space<vmem>>, vector<32x32xf32>
    %cst_46 = arith.constant dense<0.000000e+00> : vector<1x32xf32>
    %103 = tpu.matmul %96, %102, %cst_46 {dimension_numbers = #tpu.dot_dimension_numbers<[1], [0], [0], [1], [0, 0, 1, 1], [], []>} : vector<1x32xf32>, vector<32x32xf32>, vector<1x32xf32> -> vector<1x32xf32>
    %104 = arith.addf %103, %8 : vector<1x32xf32>
    %105 = tpu.transpose %100, [1, 0] : vector<1x32xf32> -> vector<32x1xf32>
    %cst_47 = arith.constant 3.125000e-02 : f32
    %106 = vector.broadcast %cst_47 : f32 to vector<1x32xf32>
    %107 = arith.mulf %104, %106 : vector<1x32xf32>
    %108 = vector.broadcast %105 : vector<32x1xf32> to vector<32x32xf32>
    %109 = vector.broadcast %107 : vector<1x32xf32> to vector<32x32xf32>
    %110 = arith.mulf %108, %109 : vector<32x32xf32>
    %cst_48 = arith.constant dense<0xFF800000> : vector<32xf32>
    %111 = vector.multi_reduction <maximumf>, %110, %cst_48 [0] : vector<32x32xf32> to vector<32xf32>
    %112 = vector.shape_cast %111 : vector<32xf32> to vector<1x32xf32>
    %113 = vector.broadcast %112 : vector<1x32xf32> to vector<32x32xf32>
    %114 = arith.subf %110, %113 : vector<32x32xf32>
    %115 = math.exp %114 : vector<32x32xf32>
    %cst_49 = arith.constant dense<0.000000e+00> : vector<32xf32>
    %116 = vector.multi_reduction <add>, %115, %cst_49 [0] : vector<32x32xf32> to vector<32xf32>
    %117 = vector.shape_cast %116 : vector<32xf32> to vector<1x32xf32>
    %118 = tpu.reciprocal %117 {approx = true} : vector<1x32xf32> -> vector<1x32xf32>
    %119 = vector.broadcast %118 : vector<1x32xf32> to vector<32x32xf32>
    %120 = arith.mulf %115, %119 : vector<32x32xf32>
    %cst_50 = arith.constant dense<0.000000e+00> : vector<1x32xf32>
    %121 = tpu.matmul %101, %120, %cst_50 {dimension_numbers = #tpu.dot_dimension_numbers<[1], [0], [0], [1], [0, 0, 1, 1], [], []>} : vector<1x32xf32>, vector<32x32xf32>, vector<1x32xf32> -> vector<1x32xf32>
    %122 = arith.addf %121, %101 : vector<1x32xf32>
    %cst_51 = arith.constant dense<0.000000e+00> : vector<1xf32>
    %123 = vector.multi_reduction <add>, %122, %cst_51 [1] : vector<1x32xf32> to vector<1xf32>
    %124 = vector.shape_cast %123 : vector<1xf32> to vector<1x1xf32>
    %cst_52 = arith.constant 3.200000e+01 : f32
    %125 = vector.broadcast %cst_52 : f32 to vector<1x1xf32>
    %126 = arith.divf %124, %125 : vector<1x1xf32>
    %127 = vector.broadcast %126 : vector<1x1xf32> to vector<1x32xf32>
    %128 = arith.subf %122, %127 : vector<1x32xf32>
    %129 = arith.mulf %128, %128 : vector<1x32xf32>
    %cst_53 = arith.constant dense<0.000000e+00> : vector<1xf32>
    %130 = vector.multi_reduction <add>, %129, %cst_53 [1] : vector<1x32xf32> to vector<1xf32>
    %131 = vector.shape_cast %130 : vector<1xf32> to vector<1x1xf32>
    %cst_54 = arith.constant 3.200000e+01 : f32
    %132 = vector.broadcast %cst_54 : f32 to vector<1x1xf32>
    %133 = arith.divf %131, %132 : vector<1x1xf32>
    %134 = vector.broadcast %126 : vector<1x1xf32> to vector<1x32xf32>
    %135 = arith.subf %122, %134 : vector<1x32xf32>
    %cst_55 = arith.constant 9.99999974E-6 : f32
    %136 = vector.broadcast %cst_55 : f32 to vector<1x1xf32>
    %137 = arith.addf %133, %136 : vector<1x1xf32>
    %138 = math.rsqrt %137 : vector<1x1xf32>
    %139 = vector.broadcast %138 : vector<1x1xf32> to vector<1x32xf32>
    %140 = arith.mulf %135, %139 : vector<1x32xf32>
    %141 = arith.mulf %140, %12 : vector<1x32xf32>
    %142 = arith.addf %141, %13 : vector<1x32xf32>
    %c296 = arith.constant 296 : index
    %c0_56 = arith.constant 0 : index
    %143 = vector.load %arg1[%c296, %c0_56] : memref<408x64xf32, #tpu.memory_space<vmem>>, vector<32x32xf32>
    %cst_57 = arith.constant dense<0.000000e+00> : vector<1x32xf32>
    %144 = tpu.matmul %142, %143, %cst_57 {dimension_numbers = #tpu.dot_dimension_numbers<[1], [0], [0], [1], [0, 0, 1, 1], [], []>} : vector<1x32xf32>, vector<32x32xf32>, vector<1x32xf32> -> vector<1x32xf32>
    %145 = arith.addf %144, %9 : vector<1x32xf32>
    %146 = arith.addf %145, %142 : vector<1x32xf32>
    %cst_58 = arith.constant dense<0.000000e+00> : vector<1xf32>
    %147 = vector.multi_reduction <add>, %146, %cst_58 [1] : vector<1x32xf32> to vector<1xf32>
    %148 = vector.shape_cast %147 : vector<1xf32> to vector<1x1xf32>
    %cst_59 = arith.constant 3.200000e+01 : f32
    %149 = vector.broadcast %cst_59 : f32 to vector<1x1xf32>
    %150 = arith.divf %148, %149 : vector<1x1xf32>
    %151 = vector.broadcast %150 : vector<1x1xf32> to vector<1x32xf32>
    %152 = arith.subf %146, %151 : vector<1x32xf32>
    %153 = arith.mulf %152, %152 : vector<1x32xf32>
    %cst_60 = arith.constant dense<0.000000e+00> : vector<1xf32>
    %154 = vector.multi_reduction <add>, %153, %cst_60 [1] : vector<1x32xf32> to vector<1xf32>
    %155 = vector.shape_cast %154 : vector<1xf32> to vector<1x1xf32>
    %cst_61 = arith.constant 3.200000e+01 : f32
    %156 = vector.broadcast %cst_61 : f32 to vector<1x1xf32>
    %157 = arith.divf %155, %156 : vector<1x1xf32>
    %158 = vector.broadcast %150 : vector<1x1xf32> to vector<1x32xf32>
    %159 = arith.subf %146, %158 : vector<1x32xf32>
    %cst_62 = arith.constant 9.99999974E-6 : f32
    %160 = vector.broadcast %cst_62 : f32 to vector<1x1xf32>
    %161 = arith.addf %157, %160 : vector<1x1xf32>
    %162 = math.rsqrt %161 : vector<1x1xf32>
    %163 = vector.broadcast %162 : vector<1x1xf32> to vector<1x32xf32>
    %164 = arith.mulf %159, %163 : vector<1x32xf32>
    %165 = arith.mulf %164, %14 : vector<1x32xf32>
    %166 = arith.addf %165, %15 : vector<1x32xf32>
    %c328 = arith.constant 328 : index
    %c0_63 = arith.constant 0 : index
    %167 = vector.load %arg1[%c328, %c0_63] : memref<408x64xf32, #tpu.memory_space<vmem>>, vector<32x32xf32>
    %cst_64 = arith.constant dense<0.000000e+00> : vector<1x32xf32>
    %168 = tpu.matmul %166, %167, %cst_64 {dimension_numbers = #tpu.dot_dimension_numbers<[1], [0], [0], [1], [0, 0, 1, 1], [], []>} : vector<1x32xf32>, vector<32x32xf32>, vector<1x32xf32> -> vector<1x32xf32>
    %169 = arith.addf %168, %10 : vector<1x32xf32>
    %cst_65 = arith.constant 0.000000e+00 : f32
    %170 = vector.broadcast %cst_65 : f32 to vector<1x32xf32>
    %171 = arith.maximumf %169, %170 : vector<1x32xf32>
    %c360 = arith.constant 360 : index
    %c0_66 = arith.constant 0 : index
    %172 = vector.load %arg1[%c360, %c0_66] : memref<408x64xf32, #tpu.memory_space<vmem>>, vector<32x8xf32>
    %cst_67 = arith.constant dense<0.000000e+00> : vector<1x8xf32>
    %173 = tpu.matmul %171, %172, %cst_67 {dimension_numbers = #tpu.dot_dimension_numbers<[1], [0], [0], [1], [0, 0, 1, 1], [], []>} : vector<1x32xf32>, vector<32x8xf32>, vector<1x8xf32> -> vector<1x8xf32>
    %174 = arith.addf %173, %11 : vector<1x8xf32>
    %175 = arith.addf %29, %174 : vector<1x8xf32>
    %c0_68 = arith.constant 0 : index
    %c0_69 = arith.constant 0 : index
    %176 = vector.load %arg2[%c0_68, %c0_69] : memref<1x8xf32, #tpu.memory_space<vmem>>, vector<1x8xf32>
    tpu.vector_store %arg2[%c0_68, %c0_69], %175 {strides = array<i32>} : memref<1x8xf32, #tpu.memory_space<vmem>>, vector<1x8xf32>,
    return
  }
}

</mosaic_0001>

<bundles_post_ra>
// kernel: hafn_forward.1
= control target key start
LH: loop header
LB: loop body
LE: loop exit
PB: predicated region body
PF: predicated region fallthrough
CT: control target
= control target key end

     0   :  { %v1649_v3 = vmov 0.0   ;;  %v1650_v4 = vmov 0.0|0.0   ;;  %vm114_vm0 = vcmask 64512   ;;  %vm1651_vm1 = vmmov 0   ;;  %s2010_s0 = inlined_call_operand.vmem [shape: f32[4,64], index: 0, kind: input, shape index: {}]   ;;  %s2011_s1 = inlined_call_operand.vmem [shape: f32[408,64], index: 1, kind: input, shape index: {}]   ;;  %s2012_s2 = inlined_call_operand.hbm [shape: f32[1,8], index: 2, kind: output, shape index: {0}]   ;;  %s2013_s3 = inlined_call_operand.vmem [shape: f32[1,64], index: 3, kind: output, shape index: {1}]  }
   0x1   :  { %v31_v0 = vld [vmem:[%s2011_s1] sm:$0xff]  ;;  %v32_v1 = vld [vmem:[%s2011_s1 + $0x8] sm:$0xff]  ;;  %v33_v2 = vld [vmem:[%s2011_s1 + $0x10] sm:$0xff]  ;;  %1371 = vmatprep.subr.mxu1 %v1649_v3  ;;  %1502 = vmatprep.subr.bf16.mxu0 %v1650_v4 }
   0x2   :  { %v1503_v5 = vpack.c.bf16 %v33_v2, %v32_v1  ;;  %v14_v6 = vld [vmem:[%s2010_s0] sm:$0x1]  ;;  %v192_v7 = vld [vmem:[%s2011_s1 + $0x48] sm:$0xff]  ;;  %v193_v8 = vld [vmem:[%s2011_s1 + $0x50] sm:$0xff]  ;;  %1372 = vmatpush3.msra.mxu1 %v31_v0  ;;  %1373 = vmatprep.mubr.msk.f32.mxu1 %vm1651_vm1, %v1649_v3 }
   0x3   :  { %v1515_v9 = vpack.c.bf16 %v193_v8, %v192_v7  ;;  %v34_v10 = vld [vmem:[%s2011_s1 + $0x18] sm:$0xff]  ;;  %v35_v11 = vld [vmem:[%s2011_s1 + $0x20] sm:$0xff]  ;;  %1374 = vmatmul.mubr.msk.f32.vlgmr.msra.gmra.mrb[0].mxu1 %vm114_vm0, %v14_v6  ;;  %1514 = vmatprep.subr.bf16.mxu1 %v1650_v4  ;;  %v36_v15 = vld [vmem:[%s2011_s1 + $0x28] sm:$0xff] }
   0x4   :  { %v194_v12 = vld [vmem:[%s2011_s1 + $0x58] sm:$0xff]  ;;  %1504 = vmatpush3.bf16.msra.mxu0 %v1503_v5  ;;  %v1506_v13 = vpack.c.bf16 %v35_v11, %v34_v10  ;;  %v195_v14 = vld [vmem:[%s2011_s1 + $0x60] sm:$0xff]  ;;  %v37_v16 = vld [vmem:[%s2011_s1 + $0x30] sm:$0xff]  ;;  %1384 = vmatprep.mubr.msk.f32.mxu1 %vm1651_vm1, %v1649_v3 }
   0x5   :  { %1505 = vmatprep.subr.bf16.mxu0 %v1650_v4  ;;  %1516 = vmatpush3.bf16.msra.mxu1 %v1515_v9  ;;  %v1518_v17 = vpack.c.bf16 %v195_v14, %v194_v12  ;;  %v270_v18 = vld [vmem:[%s2011_s1 + $0x68] sm:$0xff]  ;;  %v271_v19 = vld [vmem:[%s2011_s1 + $0x70] sm:$0xff]  ;;  %v1509_v20 = vpack.c.bf16 %v37_v16, %v36_v15  ;;  %v38_v21 = vld [vmem:[%s2011_s1 + $0x38] sm:$0xff] }
   0x6   :  { %1517 = vmatprep.subr.bf16.mxu1 %v1650_v4  ;;  %1368 = vmatprep.mubr.msk.f32.mxu0 %vm1651_vm1, %v1649_v3  ;;  %v39_v22 = vld [vmem:[%s2011_s1 + $0x40] sm:$0xff] }
   0x8   :  { %1507 = vmatpush3.bf16.msra.mxu0 %v1506_v13 }
   0x9   :  { %1508 = vmatprep.subr.bf16.mxu0 %v1650_v4 }
   0xa   :  { %9 = vsyncpa [#allocation3], 0  ;;  %1519 = vmatpush3.bf16.msra.mxu1 %v1518_v17  ;;  %v15_v23 = vld [vmem:[%s2010_s0 + $0x1] sm:$0x1]  ;;  %vm196_vm2 = vcmask 261120   ;;  %v1521_v24 = vpack.c.bf16 %v271_v19, %v270_v18  ;;  %v272_v25 = vld [vmem:[%s2011_s1 + $0x78] sm:$0xff]  ;;  %v1512_v27 = vpack.c.bf16 %v39_v22, %v38_v21  ;;  %v404_v8 = vlaneseq }
   0xb   :  { %1520 = vmatprep.subr.bf16.mxu1 %v1650_v4  ;;  %v273_v26 = vld [vmem:[%s2011_s1 + $0x80] sm:$0xff]  ;;  %v274_v29 = vld [vmem:[%s2011_s1 + $0x88] sm:$0xff]  ;;  %v275_v30 = vld [vmem:[%s2011_s1 + $0x90] sm:$0xff]  ;;  %vm40_vm3 = vcmask 523264   ;;  %v1652_v49 = vmov 0   ;;  %vm190_vm4 = vcmask 516096  }
   0xc   :  { %1510 = vmatpush3.bf16.msra.mxu0 %v1509_v20  ;;  %v1524_v28 = vpack.c.bf16 %v273_v26, %v272_v25  ;;  %v17_v31 = vld [vmem:[%s2010_s0 + $0x3] sm:$0x1]  ;;  %v1527_v32 = vpack.c.bf16 %v275_v30, %v274_v29  ;;  %v276_v33 = vld [vmem:[%s2011_s1 + $0x98] sm:$0xff]  ;;  %v16_v36 = vld [vmem:[%s2010_s0 + $0x2] sm:$0x1]  ;;  %1594 = vset.pattern.permute.xlu1 %v1652_v49  ;;  %s1653_s29 = smov 96  }
   0xd   :  { %1385 = vmatmul.mubr.msk.f32.vlgmr.msra.gmra.mrb[2].mxu1 %vm196_vm2, %v15_v23  ;;  %1511 = vmatprep.subr.bf16.mxu0 %v1650_v4  ;;  %v277_v34 = vld [vmem:[%s2011_s1 + $0xa0] sm:$0xff]  ;;  %v641_v37 = vld [vmem:[%s2011_s1 + $0xa8] sm:$0xff]  ;;  %v642_v38 = vld [vmem:[%s2011_s1 + $0xb0] sm:$0xff]  ;;  %v1827_v11 = vshrl.u32 %v404_v8, 7  ;;  %vm531_vm5 = vcmask 253952   ;;  %s1654_s8 = smov 32  }
   0xe   :  { %1522 = vmatpush3.bf16.msra.mxu1 %v1521_v24  ;;  %1403 = vmatprep.mubr.msk.f32.mxu1 %vm1651_vm1, %v1649_v3  ;;  %v1530_v35 = vpack.c.bf16 %v277_v34, %v276_v33  ;;  %v1545_v39 = vpack.c.bf16 %v642_v38, %v641_v37  ;;  %v643_v40 = vld [vmem:[%s2011_s1 + $0xb8] sm:$0xff]  ;;  %v644_v41 = vld [vmem:[%s2011_s1 + $0xc0] sm:$0xff]  ;;  %v645_v43 = vld [vmem:[%s2011_s1 + $0xc8] sm:$0xff]  ;;  %s1655_s9 = smov [#allocation2]   ;;  %vm1251_vm6 = vcmask 57344  }
   0xf   :  { %1523 = vmatprep.subr.bf16.mxu1 %v1650_v4  ;;  %v1548_v42 = vpack.c.bf16 %v644_v41, %v643_v40  ;;  %v646_v44 = vld [vmem:[%s2011_s1 + $0xd0] sm:$0xff]  ;;  %v647_v46 = vld [vmem:[%s2011_s1 + $0xd8] sm:$0xff]  ;;  %v648_v47 = vld [vmem:[%s2011_s1 + $0xe0] sm:$0xff]  ;;  %v406_v13 = vsub.s32 0, %v1827_v11  ;;  %s1259_s10 = sshll.u32 %s1655_s9, 4  ;;  %s1260_s10 = int_to_ptr.vmem [resolvable:$true] %s1259_s10 }
  0x10   :  { %1513 = vmatpush3.bf16.msra.mxu0 %v1512_v27  ;;  %v1551_v45 = vpack.c.bf16 %v646_v44, %v645_v43  ;;  %v1554_v48 = vpack.c.bf16 %v648_v47, %v647_v46  ;;  %v30_v54 = vld [vmem:[%s2011_s1 + $0x194] sm:$0x1]  ;;  %v19_v59 = vld [vmem:[%s2011_s1 + $0x189] sm:$0x1]  ;;  %v18_v9 = vld [vmem:[%s2011_s1 + $0x188] sm:$0x1]  ;;  %p1630_p1 = scmp.lt.s32.totalorder %s1260_s10, %s1260_s10 }
  0x11   :  { %1532 = vmatprep.subr.bf16.mxu0 %v1650_v4  ;;  %s1625_s11 = scalar_lea.vmem %s1260_s10, 16  ;;  %s1629_s0 = scalar_lea.vmem %s1260_s10, 32 }
  0x12   :  { %1525 = vmatpush3.bf16.msra.mxu1 %v1524_v28  ;;  %p1626_p0 = scmp.ne.s32.totalorder %s1260_s10, %s1625_s11  ;;  %p1631_p2 = scmp.lt.s32.totalorder %s1629_s0, %s1625_s11 }
  0x13   :  { %1369 = vmatmul.mubr.msk.f32.vlgmr.msra.gmra.mrb[0].mxu0 %vm40_vm3, %v17_v31  ;;  %1526 = vmatprep.subr.bf16.mxu1 %v1650_v4 }
  0x14   :  { %1414 = vmatprep.mubr.msk.f32.mxu0 %vm1651_vm1, %v1649_v3  ;;  %p1632_p3 = por %p1631_p2, %p1630_p1 }
  0x16   :  { %1528 = vmatpush3.bf16.msra.mxu1 %v1527_v32  ;;  %p1633_p4 = pnand %p1632_p3, %p1626_p0 }
  0x17   :  { %1529 = vmatprep.subr.bf16.mxu1 %v1650_v4 }
  0x1a   :  { %1531 = vmatpush3.bf16.msra.mxu1 %v1530_v35 }
  0x1b   :  { %1544 = vmatprep.subr.bf16.mxu1 %v1650_v4 }
  0x1d   :  { %1404 = vmatmul.mubr.msk.f32.vlgmr.msra.gmra.mrb[4].mxu1 %vm40_vm3, %v16_v36 }
  0x1e   :  { %1444 = vmatprep.mubr.msk.f32.mxu1 %vm1651_vm1, %v1649_v3  ;;  %1546 = vmatpush3.bf16.msra.mxu1 %v1545_v39 }
  0x1f   :  { %1547 = vmatprep.subr.bf16.mxu1 %v1650_v4 }
  0x22   :  { %1549 = vmatpush3.bf16.msra.mxu1 %v1548_v42 }
  0x23   :  { %1550 = vmatprep.subr.bf16.mxu1 %v1650_v4 }
  0x26   :  { %1552 = vmatpush3.bf16.msra.mxu1 %v1551_v45 }
  0x27   :  { %1553 = vmatprep.subr.bf16.mxu1 %v1650_v4 }
  0x2a   :  { %1555 = vmatpush3.bf16.msra.mxu1 %v1554_v48 }
  0x2b   :  { %1568 = vmatprep.subr.bf16.mxu1 %v1650_v4 }
  0xd6   :  { %v184_v50 = vpop.f32.mrb[0].mxu1 }
  0xd7   :  { %v1375_v51 = vpop.f32.mrb[1].mxu1 }
  0xe0   :  { %v266_v52 = vpop.f32.mrb[2].mxu1 }
  0xe1   :  { %v1386_v53 = vpop.f32.mrb[3].mxu1  ;;  %v1825_v10 = vadd.f32 %v266_v52, %v18_v9 }
  0xe3   :  { %v383_v12 = vmul.f32 0.03125, %v1825_v10 }
  0xe5   :  { %v407_v15 = vrot.slane %v383_v12, %v406_v13 }
  0xe6   :  { %v110_v55 = vpop.f32.mrb[0].mxu0 }
  0xe7   :  { %v185_v56 = vadd.f32 %v184_v50, %v110_v55  ;;  %v1370_v57 = vpop.f32.mrb[1].mxu0 }
  0xe9   :  { %v188_v58 = vadd.f32 %v185_v56, %v30_v54 }
  0xeb   :  { %1595 = vtanh.f32 %v188_v58 }
  0xf0   :  { %v347_v60 = vpop.f32.mrb[4].mxu1 }
  0xf1   :  { %v348_v61 = vadd.f32 %v347_v60, %v19_v59  ;;  %v1405_v62 = vpop.f32.mrb[5].mxu1 }
  0xf3   :  { %351 = vxpose.xlu0.b32.start.end [1/1] (short) (narrow) %v348_v61, 32 }
  0xf5   :  { %v1596_v63 = vpop.eup %1595 }
  0xf6   :  { %191 = vst.msk [vmem:[%s2013_s3] sm:$0x1] %vm190_vm4, %v1596_v63  ;;  %1445 = vmatmul.mubr.msk.f32.vlgmr.msra.gmra.mrb[6].mxu1 %vm40_vm3, %v1596_v63 }
  0xf7   :  { %1477 = vmatprep.mubr.msk.f32.mxu1 %vm1651_vm1, %v1649_v3 }
 0x11c   :  { %1593 = vset.pattern.permute.xlu0 %v1652_v49 }
 0x173   :  { %v367_v0 = vpop.trf.xlu0 }
 0x174   :  { %386 = vperm.xlu0 %1593, %v367_v0  }
 0x177   :  { %v368_v1 = vpop.trf.xlu0 }
 0x178   :  { %391 = vperm.xlu1 %1594, %v368_v1  }
 0x17b   :  { %v369_v2 = vpop.trf.xlu0 }
 0x17c   :  { %396 = vperm.xlu1 %1594, %v369_v2  }
 0x17f   :  { %v370_v5 = vpop.trf.xlu0 }
 0x180   :  { %401 = vperm.xlu1 %1594, %v370_v5  }
 0x184   :  { %456 = vrot.lane.b32.xlu1 %v348_v61, %s1653_s29 }
 0x1c9   :  { %v1820_v6 = vpop.f32.mrb[6].mxu1 }
 0x1ca   :  { %v1446_v7 = vpop.f32.mrb[7].mxu1 }
 0x1f3   :  { %v387_v16 = vpop.permute.xlu0 %386 }
 0x1f4   :  { %v408_v19 = vmul.f32 %v407_v15, %v387_v16 }
 0x1f6   :  { %v412_v24 = vsel %vm196_vm2, %v408_v19, -inf }
 0x1f7   :  { %v392_v14 = vpop.permute.xlu1 %391 }
 0x1f8   :  { %v409_v18 = vmul.f32 %v407_v15, %v392_v14 }
 0x1fa   :  { %v413_v22 = vsel %vm196_vm2, %v409_v18, -inf }
 0x1fb   :  { %v397_v17 = vpop.permute.xlu1 %396  ;;  %v416_v27 = vmax.f32 %v412_v24, %v413_v22  ;;  %v551_v24 = vld [vmem:[%s2011_s1 + $0x100] sm:$0xff] }
 0x1fc   :  { %v410_v20 = vmul.f32 %v407_v15, %v397_v17 }
 0x1fe   :  { %v414_v25 = vsel %vm196_vm2, %v410_v20, -inf }
 0x1ff   :  { %v402_v21 = vpop.permute.xlu1 %401 }
 0x200   :  { %v411_v23 = vmul.f32 %v407_v15, %v402_v21  ;;  %v549_v21 = vld [vmem:[%s2011_s1 + $0xf0] sm:$0xff] }
 0x202   :  { %v415_v26 = vsel %vm196_vm2, %v411_v23, -inf }
 0x203   :  { %v417_v28 = vmax.f32 %v414_v25, %v415_v26  ;;  %v457_v7 = vpop.permute.xlu1 %456 }
 0x205   :  { %v418_v29 = vmax.f32 %v416_v27, %v417_v28 }
 0x207   :  { %v419_v30 = vrot.slane %v418_v29, 4 }
 0x209   :  { %v420_v31 = vmax.f32 %v418_v29, %v419_v30  ;;  %v1865_v30 = vld [vmem:[%s2011_s1 + $0x190] sm:$0x1] }
 0x20b   :  { %v421_v32 = vrot.slane %v420_v31, 2 }
 0x20d   :  { %v422_v33 = vmax.f32 %v420_v31, %v421_v32  ;;  %v1870_v32 = vld [vmem:[%s2011_s1 + $0x191] sm:$0x1] }
 0x20f   :  { %v423_v34 = vrot.slane %v422_v33, 1 }
 0x211   :  { %v424_v35 = vmax.f32 %v422_v33, %v423_v34 }
 0x213   :  { %v425_v36 = vsub.f32 %v408_v19, %v424_v35  ;;  %v426_v37 = vsub.f32 %v409_v18, %v424_v35  ;;  %v427_v38 = vsub.f32 %v410_v20, %v424_v35  ;;  %v428_v39 = vsub.f32 %v411_v23, %v424_v35  ;;  %v548_v20 = vld [vmem:[%s2011_s1 + $0xe8] sm:$0xff]  ;;  %v550_v23 = vld [vmem:[%s2011_s1 + $0xf8] sm:$0xff] }
 0x214   :  { %v1539_v22 = vpack.c.bf16 %v549_v21, %v548_v20  ;;  %v1542_v25 = vpack.c.bf16 %v551_v24, %v550_v23  ;;  %v21_v35 = vld [vmem:[%s2011_s1 + $0x18b] sm:$0x1] }
 0x215   :  { %v429_v40 = vmul.f32 1.442695, %v425_v36  ;;  %v431_v41 = vmul.f32 1.442695, %v426_v37  ;;  %v433_v42 = vmul.f32 1.442695, %v427_v38 }
 0x216   :  { %v435_v43 = vmul.f32 1.442695, %v428_v39 }
 0x217   :  { %1597 = vpow2.f32 %v429_v40 }
 0x218   :  { %1599 = vpow2.f32 %v431_v41  ;;  %v20_v41 = vld [vmem:[%s2011_s1 + $0x18a] sm:$0x1] }
 0x219   :  { %1601 = vpow2.f32 %v433_v42  ;;  %v719_v42 = vadd.f32 %v1820_v6, %v20_v41  ;;  %v724_v6 = vld [vmem:[%s2011_s1 + $0x118] sm:$0xff] }
 0x21a   :  { %1603 = vpow2.f32 %v435_v43 }
 0x221   :  { %v1598_v44 = vpop.eup %1597 }
 0x222   :  { %v1600_v45 = vpop.eup %1599  ;;  %v437_v46 = vsel %vm196_vm2, %v1598_v44, 0.0 }
 0x223   :  { %v1602_v47 = vpop.eup %1601  ;;  %v438_v48 = vsel %vm196_vm2, %v1600_v45, 0.0 }
 0x224   :  { %v1604_v49 = vpop.eup %1603  ;;  %v439_v50 = vadd.f32 %v438_v48, %v437_v46  ;;  %v440_v51 = vsel %vm196_vm2, %v1602_v47, 0.0  ;;  %v722_v48 = vld [vmem:[%s2011_s1 + $0x108] sm:$0xff] }
 0x225   :  { %v442_v53 = vsel %vm196_vm2, %v1604_v49, 0.0 }
 0x226   :  { %v441_v52 = vadd.f32 %v440_v51, %v439_v50 }
 0x228   :  { %v443_v54 = vadd.f32 %v442_v53, %v441_v52  ;;  %v725_v52 = vld [vmem:[%s2011_s1 + $0x120] sm:$0xff] }
 0x229   :  { %v1560_v53 = vpack.c.bf16 %v725_v52, %v724_v6 }
 0x22a   :  { %v444_v55 = vrot.slane %v443_v54, 4 }
 0x22c   :  { %v445_v56 = vadd.f32 %v444_v55, %v443_v54 }
 0x22e   :  { %v446_v57 = vrot.slane %v445_v56, 2 }
 0x230   :  { %v447_v58 = vadd.f32 %v446_v57, %v445_v56 }
 0x232   :  { %v448_v59 = vrot.slane %v447_v58, 1 }
 0x234   :  { %v449_v60 = vadd.f32 %v448_v59, %v447_v58 }
 0x236   :  { %1605 = vrcp.f32 %v449_v60 }
 0x240   :  { %v1606_v61 = vpop.eup %1605 }
 0x241   :  { %v451_v62 = vmul.f32 %v1606_v61, %v1598_v44  ;;  %v452_v63 = vmul.f32 %v1606_v61, %v1600_v45  ;;  %v453_v1 = vmul.f32 %v1606_v61, %v1602_v47  ;;  %v454_v2 = vmul.f32 %v1606_v61, %v1604_v49  ;;  %v723_v49 = vld [vmem:[%s2011_s1 + $0x110] sm:$0xff] }
 0x242   :  { %v1557_v50 = vpack.c.bf16 %v723_v49, %v722_v48  ;;  %v1904_v61 = vld [vmem:[%s2011_s1 + $0x192] sm:$0x1] }
 0x243   :  { %v1533_v0 = vpack.c.bf16 %v452_v63, %v451_v62  ;;  %v1536_v5 = vpack.c.bf16 %v454_v2, %v453_v1  ;;  %v1909_v63 = vld [vmem:[%s2011_s1 + $0x193] sm:$0x1] }
 0x245   :  { %1534 = vmatpush3.bf16.msra.mxu0 %v1533_v0 }
 0x246   :  { %1535 = vmatprep.subr.bf16.mxu0 %v1650_v4 }
 0x249   :  { %1537 = vmatpush3.bf16.msra.mxu0 %v1536_v5  ;;  %v22_v5 = vld [vmem:[%s2011_s1 + $0x18c] sm:$0x1] }
 0x24a   :  { %1538 = vmatprep.subr.bf16.mxu0 %v1650_v4 }
 0x24c   :  { %1415 = vmatmul.mubr.msk.f32.vlgmr.msra.gmra.mrb[2].mxu0 %vm196_vm2, %v457_v7 }
 0x24d   :  { %1425 = vmatprep.mubr.msk.f32.mxu0 %vm1651_vm1, %v1649_v3  ;;  %1540 = vmatpush3.bf16.msra.mxu0 %v1539_v22 }
 0x24e   :  { %1541 = vmatprep.subr.bf16.mxu0 %v1650_v4 }
 0x251   :  { %1543 = vmatpush3.bf16.msra.mxu0 %v1542_v25 }
 0x252   :  { %1556 = vmatprep.subr.bf16.mxu0 %v1650_v4 }
 0x31f   :  { %v527_v8 = vpop.f32.mrb[2].mxu0 }
 0x320   :  { %v528_v9 = vadd.f32 %v527_v8, %v457_v7  ;;  %v1416_v12 = vpop.f32.mrb[3].mxu0 }
 0x322   :  { %v532_v14 = vsel %vm531_vm5, %v528_v9, 0.0 }
 0x323   :  { %533 = vadd.xlane.f32.xlu1 %v532_v14 }
 0x3b0   :  { %v534_v15 = vpop.xlane.xlu1 %533 }
 0x3b1   :  { %v536_v16 = vmul.f32 0.03125, %v534_v15 }
 0x3b3   :  { %v537_v17 = vsub.f32 %v528_v9, %v536_v16 }
 0x3b5   :  { %v538_v18 = vmul.f32 %v537_v17, %v537_v17 }
 0x3b7   :  { %v539_v19 = vsel %vm531_vm5, %v538_v18, 0.0 }
 0x3b8   :  { %540 = vadd.xlane.f32.xlu1 %v539_v19 }
 0x445   :  { %v541_v26 = vpop.xlane.xlu1 %540 }
 0x446   :  { %v542_v27 = vmul.f32 0.03125, %v541_v26 }
 0x448   :  { %v543_v28 = vadd.f32 1e-05, %v542_v27 }
 0x44a   :  { %1607 = vrsqrt.f32 %v543_v28 }
 0x454   :  { %v1608_v29 = vpop.eup %1607 }
 0x455   :  { %v545_v31 = vmul.f32 %v1608_v29, %v537_v17 }
 0x457   :  { %v546_v33 = vmul.f32 %v545_v31, %v1865_v30 }
 0x459   :  { %v547_v34 = vadd.f32 %v546_v33, %v1870_v32 }
 0x45b   :  { %1426 = vmatmul.mubr.msk.f32.vlgmr.msra.gmra.mrb[4].mxu0 %vm196_vm2, %v547_v34 }
 0x45c   :  { %1455 = vmatprep.mubr.msk.f32.mxu0 %vm1651_vm1, %v1649_v3  ;;  %1558 = vmatpush3.bf16.msra.mxu0 %v1557_v50 }
 0x45d   :  { %1559 = vmatprep.subr.bf16.mxu0 %v1650_v4 }
 0x460   :  { %1561 = vmatpush3.bf16.msra.mxu0 %v1560_v53 }
 0x461   :  { %1562 = vmatprep.subr.bf16.mxu0 %v1650_v4 }
 0x52e   :  { %v621_v36 = vpop.f32.mrb[4].mxu0 }
 0x52f   :  { %v622_v37 = vadd.f32 %v621_v36, %v21_v35  ;;  %v1427_v38 = vpop.f32.mrb[5].mxu0 }
 0x531   :  { %v625_v39 = vadd.f32 %v622_v37, %v547_v34 }
 0x533   :  { %v626_v40 = vsel %vm531_vm5, %v625_v39, 0.0 }
 0x534   :  { %627 = vadd.xlane.f32.xlu1 %v626_v40 }
 0x567   :  { %799 = vxpose.xlu1.b32.start.end [1/1] (short) (narrow) %v719_v42, 32 }
 0x5c1   :  { %v628_v43 = vpop.xlane.xlu1 %627 }
 0x5c2   :  { %v629_v44 = vmul.f32 0.03125, %v628_v43 }
 0x5c4   :  { %v630_v45 = vsub.f32 %v625_v39, %v629_v44 }
 0x5c6   :  { %v631_v46 = vmul.f32 %v630_v45, %v630_v45 }
 0x5c8   :  { %v632_v47 = vsel %vm531_vm5, %v631_v46, 0.0 }
 0x5c9   :  { %633 = vadd.xlane.f32.xlu0 %v632_v47 }
 0x5e7   :  { %v815_v51 = vpop.trf.xlu1 }
 0x5e8   :  { %834 = vperm.xlu0 %1593, %v815_v51  }
 0x5eb   :  { %v816_v54 = vpop.trf.xlu1 }
 0x5ec   :  { %839 = vperm.xlu0 %1593, %v816_v54  }
 0x5ef   :  { %v817_v55 = vpop.trf.xlu1 }
 0x5f0   :  { %844 = vperm.xlu1 %1594, %v817_v55  }
 0x5f3   :  { %v818_v56 = vpop.trf.xlu1 }
 0x5f4   :  { %849 = vperm.xlu0 %1593, %v818_v56  }
 0x5f8   :  { %904 = vrot.lane.b32.xlu0 %v719_v42, %s1653_s29 }
 0x656   :  { %v634_v57 = vpop.xlane.xlu0 %633 }
 0x657   :  { %v635_v58 = vmul.f32 0.03125, %v634_v57 }
 0x659   :  { %v636_v59 = vadd.f32 1e-05, %v635_v58 }
 0x65b   :  { %1609 = vrsqrt.f32 %v636_v59 }
 0x665   :  { %v1610_v60 = vpop.eup %1609 }
 0x666   :  { %v638_v62 = vmul.f32 %v1610_v60, %v630_v45 }
 0x667   :  { %v835_v2 = vpop.permute.xlu0 %834 }
 0x668   :  { %v639_v0 = vmul.f32 %v638_v62, %v1904_v61 }
 0x66a   :  { %v640_v1 = vadd.f32 %v639_v0, %v1909_v63 }
 0x66b   :  { %v840_v12 = vpop.permute.xlu0 %839 }
 0x66c   :  { %1456 = vmatmul.mubr.msk.f32.vlgmr.msra.gmra.mrb[6].mxu0 %vm196_vm2, %v640_v1 }
 0x66d   :  { %1466 = vmatprep.mubr.msk.f32.mxu0 %vm1651_vm1, %v1649_v3 }
 0x66f   :  { %v845_v16 = vpop.permute.xlu1 %844 }
 0x673   :  { %v850_v17 = vpop.permute.xlu0 %849 }
 0x73f   :  { %v795_v7 = vpop.f32.mrb[6].mxu0 }
 0x740   :  { %v796_v8 = vadd.f32 %v795_v7, %v22_v5  ;;  %v1457_v9 = vpop.f32.mrb[7].mxu0  ;;  %v905_v7 = vpop.permute.xlu0 %904 }
 0x742   :  { %v831_v14 = vmul.f32 0.03125, %v796_v8 }
 0x744   :  { %v855_v15 = vrot.slane %v831_v14, %v406_v13 }
 0x746   :  { %v856_v18 = vmul.f32 %v855_v15, %v835_v2  ;;  %v857_v19 = vmul.f32 %v855_v15, %v840_v12  ;;  %v858_v20 = vmul.f32 %v855_v15, %v845_v16  ;;  %v859_v21 = vmul.f32 %v855_v15, %v850_v17 }
 0x748   :  { %v860_v22 = vsel %vm196_vm2, %v856_v18, -inf  ;;  %v861_v23 = vsel %vm196_vm2, %v857_v19, -inf  ;;  %v862_v24 = vsel %vm196_vm2, %v858_v20, -inf  ;;  %v863_v25 = vsel %vm196_vm2, %v859_v21, -inf }
 0x749   :  { %v864_v26 = vmax.f32 %v860_v22, %v861_v23  ;;  %v865_v27 = vmax.f32 %v862_v24, %v863_v25  ;;  %v996_v23 = vld [vmem:[%s2011_s1 + $0x138] sm:$0xff]  ;;  %v997_v24 = vld [vmem:[%s2011_s1 + $0x140] sm:$0xff] }
 0x74a   :  { %v1572_v25 = vpack.c.bf16 %v997_v24, %v996_v23 }
 0x74b   :  { %v866_v28 = vmax.f32 %v864_v26, %v865_v27 }
 0x74d   :  { %v867_v29 = vrot.slane %v866_v28, 4 }
 0x74f   :  { %v868_v11 = vmax.f32 %v866_v28, %v867_v29 }
 0x751   :  { %v869_v13 = vrot.slane %v868_v11, 2 }
 0x753   :  { %v870_v31 = vmax.f32 %v868_v11, %v869_v13 }
 0x755   :  { %v871_v33 = vrot.slane %v870_v31, 1 }
 0x757   :  { %v872_v34 = vmax.f32 %v870_v31, %v871_v33  ;;  %v23_v33 = vld [vmem:[%s2011_s1 + $0x18d] sm:$0x1] }
 0x759   :  { %v873_v35 = vsub.f32 %v856_v18, %v872_v34  ;;  %v874_v36 = vsub.f32 %v857_v19, %v872_v34  ;;  %v875_v37 = vsub.f32 %v858_v20, %v872_v34  ;;  %v876_v38 = vsub.f32 %v859_v21, %v872_v34  ;;  %v994_v20 = vld [vmem:[%s2011_s1 + $0x128] sm:$0xff]  ;;  %v995_v21 = vld [vmem:[%s2011_s1 + $0x130] sm:$0xff] }
 0x75a   :  { %v1569_v22 = vpack.c.bf16 %v995_v21, %v994_v20 }
 0x75b   :  { %v877_v39 = vmul.f32 1.442695, %v873_v35  ;;  %v879_v40 = vmul.f32 1.442695, %v874_v36  ;;  %v881_v41 = vmul.f32 1.442695, %v875_v37 }
 0x75c   :  { %v883_v42 = vmul.f32 1.442695, %v876_v38  ;;  %1570 = vmatpush3.bf16.msra.mxu1 %v1569_v22 }
 0x75d   :  { %1611 = vpow2.f32 %v877_v39  ;;  %1571 = vmatprep.subr.bf16.mxu1 %v1650_v4 }
 0x75e   :  { %1613 = vpow2.f32 %v879_v40 }
 0x75f   :  { %1615 = vpow2.f32 %v881_v41 }
 0x760   :  { %1617 = vpow2.f32 %v883_v42  ;;  %1573 = vmatpush3.bf16.msra.mxu1 %v1572_v25  ;;  %v1088_v42 = vld [vmem:[%s2011_s1 + $0x150] sm:$0xff] }
 0x761   :  { %1580 = vmatprep.subr.bf16.mxu1 %v1650_v4 }
 0x767   :  { %v1612_v43 = vpop.eup %1611 }
 0x768   :  { %v1614_v44 = vpop.eup %1613  ;;  %v885_v45 = vsel %vm196_vm2, %v1612_v43, 0.0 }
 0x769   :  { %v1616_v46 = vpop.eup %1615  ;;  %v886_v47 = vsel %vm196_vm2, %v1614_v44, 0.0 }
 0x76a   :  { %v1618_v48 = vpop.eup %1617  ;;  %v887_v49 = vadd.f32 %v886_v47, %v885_v45  ;;  %v888_v50 = vsel %vm196_vm2, %v1616_v46, 0.0  ;;  %v1090_v45 = vld [vmem:[%s2011_s1 + $0x160] sm:$0xff]  ;;  %v1165_v47 = vld [vmem:[%s2011_s1 + $0x168] sm:$0xff] }
 0x76b   :  { %v890_v6 = vsel %vm196_vm2, %v1618_v48, 0.0 }
 0x76c   :  { %v889_v51 = vadd.f32 %v888_v50, %v887_v49 }
 0x76e   :  { %v891_v52 = vadd.f32 %v890_v6, %v889_v51 }
 0x770   :  { %v892_v53 = vrot.slane %v891_v52, 4 }
 0x772   :  { %v893_v54 = vadd.f32 %v892_v53, %v891_v52 }
 0x774   :  { %v894_v55 = vrot.slane %v893_v54, 2 }
 0x776   :  { %v895_v56 = vadd.f32 %v894_v55, %v893_v54 }
 0x778   :  { %v896_v57 = vrot.slane %v895_v56, 1 }
 0x77a   :  { %v897_v58 = vadd.f32 %v896_v57, %v895_v56  ;;  %v1167_v56 = vld [vmem:[%s2011_s1 + $0x178] sm:$0xff] }
 0x77c   :  { %1619 = vrcp.f32 %v897_v58  ;;  %v24_v58 = vld [vmem:[%s2011_s1 + $0x18e] sm:$0x1] }
 0x786   :  { %v1620_v59 = vpop.eup %1619 }
 0x787   :  { %v899_v60 = vmul.f32 %v1620_v59, %v1612_v43  ;;  %v900_v62 = vmul.f32 %v1620_v59, %v1614_v44  ;;  %v901_v1 = vmul.f32 %v1620_v59, %v1616_v46  ;;  %v902_v2 = vmul.f32 %v1620_v59, %v1618_v48  ;;  %v1089_v44 = vld [vmem:[%s2011_s1 + $0x158] sm:$0xff]  ;;  %v1166_v48 = vld [vmem:[%s2011_s1 + $0x170] sm:$0xff] }
 0x788   :  { %v1578_v46 = vpack.c.bf16 %v1090_v45, %v1089_v44  ;;  %v1581_v49 = vpack.c.bf16 %v1166_v48, %v1165_v47 }
 0x789   :  { %v1563_v0 = vpack.c.bf16 %v900_v62, %v899_v60  ;;  %v1566_v5 = vpack.c.bf16 %v902_v2, %v901_v1  ;;  %v25_v62 = vld [vmem:[%s2011_s1 + $0x18f] sm:$0x1] }
 0x78b   :  { %1564 = vmatpush3.bf16.msra.mxu0 %v1563_v0 }
 0x78c   :  { %1565 = vmatprep.subr.bf16.mxu0 %v1650_v4 }
 0x78f   :  { %1567 = vmatpush3.bf16.msra.mxu0 %v1566_v5 }
 0x790   :  { %1574 = vmatprep.subr.bf16.mxu0 %v1650_v4 }
 0x792   :  { %1467 = vmatmul.mubr.msk.f32.vlgmr.msra.gmra.mrb[8].mxu0 %vm196_vm2, %v905_v7 }
 0x793   :  { %1488 = vmatprep.mubr.msk.f32.mxu0 %vm1651_vm1, %v1649_v3 }
 0x865   :  { %v975_v8 = vpop.f32.mrb[8].mxu0 }
 0x866   :  { %v976_v9 = vadd.f32 %v975_v8, %v905_v7  ;;  %v1468_v12 = vpop.f32.mrb[9].mxu0 }
 0x868   :  { %v979_v14 = vsel %vm531_vm5, %v976_v9, 0.0 }
 0x869   :  { %980 = vadd.xlane.f32.xlu0 %v979_v14 }
 0x8f6   :  { %v981_v15 = vpop.xlane.xlu0 %980 }
 0x8f7   :  { %v982_v16 = vmul.f32 0.03125, %v981_v15 }
 0x8f9   :  { %v983_v17 = vsub.f32 %v976_v9, %v982_v16 }
 0x8fb   :  { %v984_v18 = vmul.f32 %v983_v17, %v983_v17 }
 0x8fd   :  { %v985_v19 = vsel %vm531_vm5, %v984_v18, 0.0 }
 0x8fe   :  { %986 = vadd.xlane.f32.xlu0 %v985_v19 }
 0x98b   :  { %v987_v26 = vpop.xlane.xlu0 %986 }
 0x98c   :  { %v988_v27 = vmul.f32 0.03125, %v987_v26 }
 0x98e   :  { %v989_v28 = vadd.f32 1e-05, %v988_v27 }
 0x990   :  { %1621 = vrsqrt.f32 %v989_v28 }
 0x99a   :  { %v1622_v29 = vpop.eup %1621 }
 0x99b   :  { %v991_v11 = vmul.f32 %v1622_v29, %v983_v17 }
 0x99d   :  { %v992_v13 = vmul.f32 %v991_v11, %v1865_v30 }
 0x99f   :  { %v993_v31 = vadd.f32 %v992_v13, %v1870_v32 }
 0x9a1   :  { %1478 = vmatmul.mubr.msk.f32.vlgmr.msra.gmra.mrb[8].mxu1 %vm196_vm2, %v993_v31 }
 0x9a2   :  { %1499 = vmatprep.mubr.msk.f32.mxu1 %vm1651_vm1, %v1649_v3  ;;  %v1087_v3 = vld [vmem:[%s2011_s1 + $0x148] sm:$0xff]  ;;  %1582 = vmatpush3.bf16.msra.mxu1 %v1581_v49 }
 0x9a3   :  { %v1575_v43 = vpack.c.bf16 %v1088_v42, %v1087_v3  ;;  %1583 = vmatprep.subr.bf16.mxu1 %v1650_v4 }
 0x9a5   :  { %1576 = vmatpush3.bf16.msra.mxu0 %v1575_v43 }
 0x9a6   :  { %1577 = vmatprep.subr.bf16.mxu0 %v1650_v4  ;;  %v1168_v4 = vld [vmem:[%s2011_s1 + $0x180] sm:$0xff] }
 0x9a7   :  { %v1584_v57 = vpack.c.bf16 %v1168_v4, %v1167_v56 }
 0x9a9   :  { %1579 = vmatpush3.bf16.msra.mxu0 %v1578_v46  ;;  %1585 = vmatpush3.bf16.msra.mxu1 %v1584_v57 }
 0xa74   :  { %v1067_v34 = vpop.f32.mrb[8].mxu1 }
 0xa75   :  { %v1068_v35 = vadd.f32 %v1067_v34, %v23_v33  ;;  %v1479_v36 = vpop.f32.mrb[9].mxu1 }
 0xa77   :  { %v1071_v37 = vadd.f32 %v1068_v35, %v993_v31 }
 0xa79   :  { %v1072_v38 = vsel %vm531_vm5, %v1071_v37, 0.0 }
 0xa7a   :  { %1073 = vadd.xlane.f32.xlu1 %v1072_v38 }
 0xb07   :  { %v1074_v39 = vpop.xlane.xlu1 %1073 }
 0xb08   :  { %v1075_v30 = vmul.f32 0.03125, %v1074_v39 }
 0xb0a   :  { %v1076_v40 = vsub.f32 %v1071_v37, %v1075_v30 }
 0xb0c   :  { %v1077_v32 = vmul.f32 %v1076_v40, %v1076_v40 }
 0xb0e   :  { %v1078_v41 = vsel %vm531_vm5, %v1077_v32, 0.0 }
 0xb0f   :  { %1079 = vadd.xlane.f32.xlu0 %v1078_v41 }
 0xb9c   :  { %v1080_v50 = vpop.xlane.xlu0 %1079 }
 0xb9d   :  { %v1081_v51 = vmul.f32 0.03125, %v1080_v50 }
 0xb9f   :  { %v1082_v6 = vadd.f32 1e-05, %v1081_v51 }
 0xba1   :  { %1623 = vrsqrt.f32 %v1082_v6 }
 0xbab   :  { %v1624_v52 = vpop.eup %1623 }
 0xbac   :  { %v1084_v53 = vmul.f32 %v1624_v52, %v1076_v40 }
 0xbae   :  { %v1085_v54 = vmul.f32 %v1084_v53, %v1904_v61 }
 0xbb0   :  { %v1086_v55 = vadd.f32 %v1085_v54, %v1909_v63 }
 0xbb2   :  { %1489 = vmatmul.mubr.msk.f32.vlgmr.msra.gmra.mrb[10].mxu0 %vm196_vm2, %v1086_v55 }
 0xc85   :  { %v1160_v59 = vpop.f32.mrb[10].mxu0 }
 0xc86   :  { %v1161_v61 = vadd.f32 %v1160_v59, %v24_v58  ;;  %v1490_v60 = vpop.f32.mrb[11].mxu0 }
 0xc88   :  { %v1164_v63 = vmax.f32 %v1161_v61, 0.0 }
 0xc8a   :  { %1500 = vmatmul.mubr.msk.f32.vlgmr.msra.gmra.mrb[10].mxu1 %vm196_vm2, %v1164_v63 }
 0xd5d   :  { %v1238_v0 = vpop.f32.mrb[10].mxu1 }
 0xd5e   :  { %v1239_v1 = vadd.f32 %v1238_v0, %v25_v62  ;;  %v1501_v2 = vpop.f32.mrb[11].mxu1 }
 0xd60   :  { %1243 = vrot.lane.b32.xlu0 %v1239_v1, %s1654_s8 }
 0xdd2   :  { %v1244_v5 = vpop.permute.xlu0 %1243 }
 0xdd3   :  { %v1246_v7 = vadd.f32 %v1244_v5, %v1825_v10 }
 0xdd5   :  { %1248 = vrot.lane.b32.xlu0 %v1246_v7, %s1653_s29 }
 0xe47   :  { %v1249_v8 = vpop.permute.xlu0 %1248 }
 0xe48   :  { %1252 = vst.msk [vmem:[#allocation2] sm:$0x1] %vm1251_vm6, %v1249_v8 }
 0xe49   :  { %1636 = shalt.err (!%p1633_p4)
}
 0xe4a   :  { %s1637_s13 = scalar_lea.hbm %s2012_s2, 16 }
 0xe4b   :  { %p1638_p5 = scmp.ne.s32.totalorder %s2012_s2, %s1637_s13  ;;  %p1641_p6 = scmp.lt.u32.totalorder %s1637_s13, %s2012_s2 }
 0xe4d   :  { %p1643_p7 = pnand %p1641_p6, %p1638_p5 }
 0xe4f   :  { %1646 = shalt.err (!%p1643_p7)
}
 0xe50   :  { %1262 = dma.vmem_to_hbm [thread:$0]  %s1260_s10, 16, %s2012_s2, [#allocation3]  }
 0xe51   :  { %1647 = dma.done.wait [#allocation3], 16  }
 0xe52   :  { %1648 = vsyncadd [#allocation3], 4294967280 }
 0xe53   :  { %1270 = vsyncpa [#allocation3], 1 }

</bundles_post_ra>
